<compile_context>
chip_gen: v7x
topology: tpu7x:2x2x1
jax: 0.10.0
libtpu: 0.0.40
codegen_flags: <defaults>
</compile_context>

<pallas_src>
import jax
import jax.numpy as jnp
from jax.experimental import pallas as pl
from jax.experimental.pallas import tpu as pltpu

GAMMA = 2          # fixed in the module; gamma=2 lets us use p*p instead of pow
ALPHA = 0.25
EPS = 1e-6

_F32_WORK_SLABS = 8                       # conservative in-kernel f32 working set
_VMEM_RESIDENCY_BUDGET = 16 * 1024 * 1024 # target residency per grid step
_MAX_TILE_LANES = 65536


def _cdiv(a, b):
    return -(-a // b)


def _pad_rows(rows, itemsize):
    """Rows physically padded to the sublane pack of this dtype."""
    pack = max(8, 32 // max(int(itemsize), 1))   # f32: 8, bf16: 16, int8: 32
    return _cdiv(rows, pack) * pack


def _bytes_per_lane(rows, p_itemsize, t_itemsize):
    """VMEM bytes resident per lane of a tile: padded, double-buffered inputs
    plus the in-kernel f32 cast/working set."""
    b = 0
    for it in (p_itemsize, t_itemsize):
        b += 2 * _pad_rows(rows, it) * it            # 2 pipeline buffers each
    b += _F32_WORK_SLABS * _pad_rows(rows, 4) * 4    # f32 cast + temporaries
    return b


def _vmem_budget():
    try:
        cap = int(pltpu.get_tpu_info().vmem_capacity_bytes)
    except Exception:
        cap = 64 * 1024 * 1024           # v7x per-TensorCore capacity (smallest)
    return min(cap // 4, _VMEM_RESIDENCY_BUDGET)


def _choose_tiling(hw, bytes_per_lane, budget_bytes):
    """Return (tile_hw, num_tiles, hw_padded)."""
    cap = (min(budget_bytes // max(bytes_per_lane, 1), _MAX_TILE_LANES) // 128) * 128
    cap = max(cap, 128)
    min_tiles = 4 if hw >= 4 * 128 else (2 if hw >= 2 * 128 else 1)

    # Path 1: exact divisor tile (no padded columns) when a non-degenerate
    # (>= 512 lanes) one exists within the VMEM cap.
    if hw % 128 == 0:
        n128 = hw // 128
        best = 0
        for d in range(1, min(n128, cap // 128) + 1):
            if n128 % d == 0 and n128 // d >= min_tiles:
                best = d
        if best * 128 >= min(512, cap):
            tile = best * 128
            return tile, hw // tile, hw

    # Path 2: zero-pad HW up to num_tiles * tile (analytically corrected).
    num_tiles = max(min_tiles, _cdiv(hw, cap))
    if num_tiles > 1 and num_tiles % 2:
        num_tiles += 1                    # balanced megacore split
    tile = max(128, _cdiv(_cdiv(hw, num_tiles), 128) * 128)
    return tile, num_tiles, num_tiles * tile


def _make_kernel(B, C, assume_nonneg):
    inv_bc = 1.0 / (B * C)
    inv_b = 1.0 / B
    inv_out = 1.0 / (8 * 128)

    def kernel(pred_ref, target_ref, out_ref):
        # Cast AFTER the VMEM load: HBM traffic stays in the input dtype.
        p = pred_ref[...].astype(jnp.float32)     # (B*C, T), lane/sublane dense
        t = target_ref[...].astype(jnp.float32)

        # ---- focal-style CE term (gamma=2 -> p*p, no pow). The -(1-alpha)
        # and -alpha scalars are folded into the scalar epilogue. -------------
        one_m_p = 1.0 - p
        s1 = (p * p) * ((1.0 - t) * jnp.log(one_m_p + EPS))
        s2 = (one_m_p * one_m_p) * (t * jnp.log(p + EPS))
        # Reduce lanes first, then rows (better f32 accumulation on big tiles).
        sum1 = jnp.sum(jnp.sum(s1, axis=-1, keepdims=True))
        sum2 = jnp.sum(jnp.sum(s2, axis=-1, keepdims=True))
        sum_temp = (ALPHA - 1.0) * sum1 - ALPHA * sum2

        # ---- dice term: channel reductions on static row slices of the dense
        # 2-D slab; algebraically fused:
        #   inter_neg = C - sum(p+t) + inter_pos ;  card_neg = 2C - card_pos --
        sum_dice = 0.0
        for b in range(B):
            pb = p[b * C:(b + 1) * C, :]                       # (C, T)
            tb = t[b * C:(b + 1) * C, :]
            ip = jnp.sum(pb * tb, axis=0, keepdims=True)       # (1, T)
            spt = jnp.sum(pb + tb, axis=0, keepdims=True)      # (1, T)
            if assume_nonneg:
                cp = spt                                       # |p|+|t| == p+t
            else:
                cp = jnp.sum(jnp.abs(pb) + jnp.abs(tb), axis=0, keepdims=True)
            inter_neg = (float(C) - spt) + ip                  # sum((1-p)(1-t))
            card_neg = float(2 * C) - cp                       # sum(2-|p|-|t|)
            dice_b = (ip + EPS) / (cp + EPS) + (inter_neg + EPS) / (card_neg + EPS)
            sum_dice = sum_dice + jnp.sum(dice_b)

        # Per-tile partial (the 1.5*HW constant and the zero-padding dice
        # correction are added once in the wrapper).  Spread over the (8,128)
        # block so the wrapper reduction is a plain jnp.sum.
        partial = sum_temp * inv_bc - sum_dice * inv_b
        out_ref[...] = jnp.full(out_ref.shape, partial * inv_out,
                                dtype=out_ref.dtype)

    return kernel


def l_ca_loss(pred, target, *, assume_nonneg_inputs=False, tile_hw=None):
    """L_ca focal + dice loss.  pred, target: (B, C, H, W); pred in (0, 1).

    assume_nonneg_inputs=True drops the |.| slab and one channel reduction
    (exact whenever pred, target >= 0); default keeps the spec's abs() path.
    """
    assert pred.shape == target.shape and pred.ndim == 4
    B, C, H, W = pred.shape
    HW = H * W
    rows = B * C

    # No wrapper-side dtype cast: narrow dtypes stay narrow over HBM.
    p2 = pred.reshape(rows, HW)
    t2 = target.reshape(rows, HW)

    bpl = _bytes_per_lane(rows, p2.dtype.itemsize, t2.dtype.itemsize)
    if tile_hw is None:
        tile_hw, num_tiles, hw_padded = _choose_tiling(HW, bpl, _vmem_budget())
    else:
        tile_hw = max(128, _cdiv(int(tile_hw), 128) * 128)
        num_tiles = _cdiv(HW, tile_hw)
        hw_padded = num_tiles * tile_hw

    # Zero-pad HW: a zero column has zero focal loss and a closed-form dice
    # contribution that is subtracted below (keeps the tiled path always on).
    n_pad = hw_padded - HW
    if n_pad:
        p2 = jnp.pad(p2, ((0, 0), (0, n_pad)))
        t2 = jnp.pad(t2, ((0, 0), (0, n_pad)))

    # Keep the compiler's scoped-VMEM ceiling consistent with the chosen tile
    # (safe on all generations: well under v7x's 64 MiB/TC physical VMEM).
    resident = tile_hw * bpl + (1 << 20)
    vmem_limit = int(min(max(resident * 3 // 2, 24 << 20), 48 << 20))

    out = pl.pallas_call(
        _make_kernel(B, C, assume_nonneg_inputs),
        out_shape=jax.ShapeDtypeStruct((num_tiles * 8, 128), jnp.float32),
        grid=(num_tiles,),
        in_specs=[
            pl.BlockSpec((rows, tile_hw), lambda i: (0, i)),
            pl.BlockSpec((rows, tile_hw), lambda i: (0, i)),
        ],
        # Each grid step owns its own lane-dense (8,128) partial block, so the
        # grid axis is "parallel" (both v7x TensorCores stream tiles).
        out_specs=pl.BlockSpec((8, 128), lambda i: (i, 0)),
        compiler_params=pltpu.CompilerParams(
            dimension_semantics=("parallel",),
            vmem_limit_bytes=vmem_limit),
    )(p2, t2)

    # Each padded (all-zero) column adds exactly 1 + (C+eps)/(2C+eps) to
    # mean-over-batch dice; its focal term is exactly 0.
    pad_fix = n_pad * (1.0 + (C + EPS) / (2.0 * C + EPS))
    return jnp.sum(out) + (1.5 * HW + pad_fix)


def l_ca_loss_ref(pred, target):
    """Pure-JAX reference mirroring the PyTorch forward exactly."""
    p = pred.astype(jnp.float32)
    t = target.astype(jnp.float32)
    temp1 = -(1.0 - ALPHA) * (p ** GAMMA) * ((1.0 - t) * jnp.log(1.0 - p + EPS))
    temp2 = -ALPHA * ((1.0 - p) ** GAMMA) * (t * jnp.log(p + EPS))
    temp = temp1 + temp2
    ce = jnp.sum(jnp.mean(temp, axis=(0, 1)))
    inter_pos = jnp.sum(p * t, axis=1)
    card_pos = jnp.sum(jnp.abs(p) + jnp.abs(t), axis=1)
    dice_pos = (inter_pos + EPS) / (card_pos + EPS)
    inter_neg = jnp.sum((1.0 - p) * (1.0 - t), axis=1)
    card_neg = jnp.sum(2.0 - jnp.abs(p) - jnp.abs(t), axis=1)
    dice_neg = (inter_neg + EPS) / (card_neg + EPS)
    dice = jnp.sum(jnp.mean(1.5 - dice_pos - dice_neg, axis=0))
    return ce + dice


if __name__ == "__main__":
    key = jax.random.PRNGKey(0)
    k1, k2, k3, k4 = jax.random.split(key, 4)

    # Case 1: B=2, C=4, 16x16  (HW=256 -> two 128-wide tiles, no padding).
    B, C, H, W = 2, 4, 16, 16
    # pred must be a probability map (log(pred), log(1-pred) are taken).
    pred = jax.nn.sigmoid(jax.random.normal(k1, (B, C, H, W), jnp.float32))
    target = (jax.random.uniform(k2, (B, C, H, W)) > 0.5).astype(jnp.float32)
    ref = l_ca_loss_ref(pred, target)
    out = jax.block_until_ready(l_ca_loss(pred, target))
    out_nn = jax.block_until_ready(
        l_ca_loss(pred, target, assume_nonneg_inputs=True))
    assert jnp.allclose(out, ref, rtol=1e-5, atol=1e-5), (out, ref)
    assert jnp.allclose(out_nn, ref, rtol=1e-5, atol=1e-5), (out_nn, ref)

    # Case 2: HW=225 (not a multiple of 128) and B*C=6 (not a multiple of 8)
    # -> exercises zero-column padding + analytic dice correction.
    B2, C2, H2, W2 = 2, 3, 15, 15
    pred2 = jax.nn.sigmoid(jax.random.normal(k3, (B2, C2, H2, W2), jnp.float32))
    target2 = (jax.random.uniform(k4, (B2, C2, H2, W2)) > 0.5).astype(jnp.float32)
    ref2 = l_ca_loss_ref(pred2, target2)
    out2 = jax.block_until_ready(l_ca_loss(pred2, target2))
    assert jnp.allclose(out2, ref2, rtol=1e-5, atol=1e-5), (out2, ref2)

    print("KERNEL_OK")
</pallas_src>

<mosaic_0001>
module attributes {stable_mosaic.version = 11 : i64} {
  func.func @kernel(%arg0: i32, %arg1: memref<8x128xf32, #tpu.memory_space<vmem>>, %arg2: memref<8x128xf32, #tpu.memory_space<vmem>>, %arg3: memref<8x128xf32, #tpu.memory_space<vmem>>) attributes {dimension_semantics = [#tpu.dimension_semantics<parallel>], iteration_bounds = array<i64: 2>, scalar_prefetch = 0 : i64, scratch_operands = 0 : i64, tpu.core_type = #tpu.core_type<tc>, window_params = [{transform_indices = @transform_0, window_bounds = array<i64: 8, 128>}, {transform_indices = @transform_1, window_bounds = array<i64: 8, 128>}, {transform_indices = @transform_2, window_bounds = array<i64: 8, 128>}]} {
    %c0 = arith.constant 0 : index
    %c0_0 = arith.constant 0 : index
    %0 = vector.load %arg1[%c0, %c0_0] : memref<8x128xf32, #tpu.memory_space<vmem>>, vector<8x128xf32>
    %c0_1 = arith.constant 0 : index
    %c0_2 = arith.constant 0 : index
    %1 = vector.load %arg2[%c0_1, %c0_2] : memref<8x128xf32, #tpu.memory_space<vmem>>, vector<8x128xf32>
    %cst = arith.constant 1.000000e+00 : f32
    %2 = vector.broadcast %cst : f32 to vector<8x128xf32>
    %3 = arith.subf %2, %0 : vector<8x128xf32>
    %4 = arith.mulf %0, %0 : vector<8x128xf32>
    %cst_3 = arith.constant 1.000000e+00 : f32
    %5 = vector.broadcast %cst_3 : f32 to vector<8x128xf32>
    %6 = arith.subf %5, %1 : vector<8x128xf32>
    %cst_4 = arith.constant 9.99999997E-7 : f32
    %7 = vector.broadcast %cst_4 : f32 to vector<8x128xf32>
    %8 = arith.addf %3, %7 : vector<8x128xf32>
    %9 = math.log %8 : vector<8x128xf32>
    %10 = arith.mulf %6, %9 : vector<8x128xf32>
    %11 = arith.mulf %4, %10 : vector<8x128xf32>
    %12 = arith.mulf %3, %3 : vector<8x128xf32>
    %cst_5 = arith.constant 9.99999997E-7 : f32
    %13 = vector.broadcast %cst_5 : f32 to vector<8x128xf32>
    %14 = arith.addf %0, %13 : vector<8x128xf32>
    %15 = math.log %14 : vector<8x128xf32>
    %16 = arith.mulf %1, %15 : vector<8x128xf32>
    %17 = arith.mulf %12, %16 : vector<8x128xf32>
    %cst_6 = arith.constant dense<0.000000e+00> : vector<8xf32>
    %18 = vector.multi_reduction <add>, %11, %cst_6 [1] : vector<8x128xf32> to vector<8xf32>
    %19 = vector.shape_cast %18 : vector<8xf32> to vector<8x1xf32>
    %20 = vector.shape_cast %19 : vector<8x1xf32> to vector<1x8x1xf32>
    %cst_7 = arith.constant dense<0.000000e+00> : vector<1xf32>
    %21 = vector.multi_reduction <add>, %20, %cst_7 [1, 2] : vector<1x8x1xf32> to vector<1xf32>
    %22 = vector.shape_cast %21 : vector<1xf32> to vector<1x1x1xf32>
    %23 = vector.extract %22[0, 0, 0] : f32 from vector<1x1x1xf32>
    %cst_8 = arith.constant dense<0.000000e+00> : vector<8xf32>
    %24 = vector.multi_reduction <add>, %17, %cst_8 [1] : vector<8x128xf32> to vector<8xf32>
    %25 = vector.shape_cast %24 : vector<8xf32> to vector<8x1xf32>
    %26 = vector.shape_cast %25 : vector<8x1xf32> to vector<1x8x1xf32>
    %cst_9 = arith.constant dense<0.000000e+00> : vector<1xf32>
    %27 = vector.multi_reduction <add>, %26, %cst_9 [1, 2] : vector<1x8x1xf32> to vector<1xf32>
    %28 = vector.shape_cast %27 : vector<1xf32> to vector<1x1x1xf32>
    %29 = vector.extract %28[0, 0, 0] : f32 from vector<1x1x1xf32>
    %cst_10 = arith.constant -7.500000e-01 : f32
    %30 = arith.mulf %cst_10, %23 : f32
    %cst_11 = arith.constant 2.500000e-01 : f32
    %31 = arith.mulf %cst_11, %29 : f32
    %32 = arith.subf %30, %31 : f32
    %33 = vector.extract_strided_slice %0 {offsets = [0, 0], sizes = [4, 128], strides = [1, 1]} : vector<8x128xf32> to vector<4x128xf32>
    %34 = vector.extract_strided_slice %1 {offsets = [0, 0], sizes = [4, 128], strides = [1, 1]} : vector<8x128xf32> to vector<4x128xf32>
    %35 = arith.mulf %33, %34 : vector<4x128xf32>
    %cst_12 = arith.constant dense<0.000000e+00> : vector<128xf32>
    %36 = vector.multi_reduction <add>, %35, %cst_12 [0] : vector<4x128xf32> to vector<128xf32>
    %37 = vector.shape_cast %36 : vector<128xf32> to vector<1x128xf32>
    %38 = arith.addf %33, %34 : vector<4x128xf32>
    %cst_13 = arith.constant dense<0.000000e+00> : vector<128xf32>
    %39 = vector.multi_reduction <add>, %38, %cst_13 [0] : vector<4x128xf32> to vector<128xf32>
    %40 = vector.shape_cast %39 : vector<128xf32> to vector<1x128xf32>
    %41 = math.absf %33 : vector<4x128xf32>
    %42 = math.absf %34 : vector<4x128xf32>
    %43 = arith.addf %41, %42 : vector<4x128xf32>
    %cst_14 = arith.constant dense<0.000000e+00> : vector<128xf32>
    %44 = vector.multi_reduction <add>, %43, %cst_14 [0] : vector<4x128xf32> to vector<128xf32>
    %45 = vector.shape_cast %44 : vector<128xf32> to vector<1x128xf32>
    %cst_15 = arith.constant 4.000000e+00 : f32
    %46 = vector.broadcast %cst_15 : f32 to vector<1x128xf32>
    %47 = arith.subf %46, %40 : vector<1x128xf32>
    %48 = arith.addf %47, %37 : vector<1x128xf32>
    %cst_16 = arith.constant 8.000000e+00 : f32
    %49 = vector.broadcast %cst_16 : f32 to vector<1x128xf32>
    %50 = arith.subf %49, %45 : vector<1x128xf32>
    %cst_17 = arith.constant 9.99999997E-7 : f32
    %51 = vector.broadcast %cst_17 : f32 to vector<1x128xf32>
    %52 = arith.addf %37, %51 : vector<1x128xf32>
    %cst_18 = arith.constant 9.99999997E-7 : f32
    %53 = vector.broadcast %cst_18 : f32 to vector<1x128xf32>
    %54 = arith.addf %45, %53 : vector<1x128xf32>
    %55 = arith.divf %52, %54 : vector<1x128xf32>
    %cst_19 = arith.constant 9.99999997E-7 : f32
    %56 = vector.broadcast %cst_19 : f32 to vector<1x128xf32>
    %57 = arith.addf %48, %56 : vector<1x128xf32>
    %cst_20 = arith.constant 9.99999997E-7 : f32
    %58 = vector.broadcast %cst_20 : f32 to vector<1x128xf32>
    %59 = arith.addf %50, %58 : vector<1x128xf32>
    %60 = arith.divf %57, %59 : vector<1x128xf32>
    %61 = arith.addf %55, %60 : vector<1x128xf32>
    %62 = vector.shape_cast %61 : vector<1x128xf32> to vector<1x1x128xf32>
    %cst_21 = arith.constant dense<0.000000e+00> : vector<1xf32>
    %63 = vector.multi_reduction <add>, %62, %cst_21 [1, 2] : vector<1x1x128xf32> to vector<1xf32>
    %64 = vector.shape_cast %63 : vector<1xf32> to vector<1x1x1xf32>
    %65 = vector.extract %64[0, 0, 0] : f32 from vector<1x1x1xf32>
    %cst_22 = arith.constant 0.000000e+00 : f32
    %66 = arith.addf %cst_22, %65 : f32
    %67 = vector.extract_strided_slice %0 {offsets = [4, 0], sizes = [4, 128], strides = [1, 1]} : vector<8x128xf32> to vector<4x128xf32>
    %68 = vector.extract_strided_slice %1 {offsets = [4, 0], sizes = [4, 128], strides = [1, 1]} : vector<8x128xf32> to vector<4x128xf32>
    %69 = arith.mulf %67, %68 : vector<4x128xf32>
    %cst_23 = arith.constant dense<0.000000e+00> : vector<128xf32>
    %70 = vector.multi_reduction <add>, %69, %cst_23 [0] : vector<4x128xf32> to vector<128xf32>
    %71 = vector.shape_cast %70 : vector<128xf32> to vector<1x128xf32>
    %72 = arith.addf %67, %68 : vector<4x128xf32>
    %cst_24 = arith.constant dense<0.000000e+00> : vector<128xf32>
    %73 = vector.multi_reduction <add>, %72, %cst_24 [0] : vector<4x128xf32> to vector<128xf32>
    %74 = vector.shape_cast %73 : vector<128xf32> to vector<1x128xf32>
    %75 = math.absf %67 : vector<4x128xf32>
    %76 = math.absf %68 : vector<4x128xf32>
    %77 = arith.addf %75, %76 : vector<4x128xf32>
    %cst_25 = arith.constant dense<0.000000e+00> : vector<128xf32>
    %78 = vector.multi_reduction <add>, %77, %cst_25 [0] : vector<4x128xf32> to vector<128xf32>
    %79 = vector.shape_cast %78 : vector<128xf32> to vector<1x128xf32>
    %cst_26 = arith.constant 4.000000e+00 : f32
    %80 = vector.broadcast %cst_26 : f32 to vector<1x128xf32>
    %81 = arith.subf %80, %74 : vector<1x128xf32>
    %82 = arith.addf %81, %71 : vector<1x128xf32>
    %cst_27 = arith.constant 8.000000e+00 : f32
    %83 = vector.broadcast %cst_27 : f32 to vector<1x128xf32>
    %84 = arith.subf %83, %79 : vector<1x128xf32>
    %cst_28 = arith.constant 9.99999997E-7 : f32
    %85 = vector.broadcast %cst_28 : f32 to vector<1x128xf32>
    %86 = arith.addf %71, %85 : vector<1x128xf32>
    %cst_29 = arith.constant 9.99999997E-7 : f32
    %87 = vector.broadcast %cst_29 : f32 to vector<1x128xf32>
    %88 = arith.addf %79, %87 : vector<1x128xf32>
    %89 = arith.divf %86, %88 : vector<1x128xf32>
    %cst_30 = arith.constant 9.99999997E-7 : f32
    %90 = vector.broadcast %cst_30 : f32 to vector<1x128xf32>
    %91 = arith.addf %82, %90 : vector<1x128xf32>
    %cst_31 = arith.constant 9.99999997E-7 : f32
    %92 = vector.broadcast %cst_31 : f32 to vector<1x128xf32>
    %93 = arith.addf %84, %92 : vector<1x128xf32>
    %94 = arith.divf %91, %93 : vector<1x128xf32>
    %95 = arith.addf %89, %94 : vector<1x128xf32>
    %96 = vector.shape_cast %95 : vector<1x128xf32> to vector<1x1x128xf32>
    %cst_32 = arith.constant dense<0.000000e+00> : vector<1xf32>
    %97 = vector.multi_reduction <add>, %96, %cst_32 [1, 2] : vector<1x1x128xf32> to vector<1xf32>
    %98 = vector.shape_cast %97 : vector<1xf32> to vector<1x1x1xf32>
    %99 = vector.extract %98[0, 0, 0] : f32 from vector<1x1x1xf32>
    %100 = arith.addf %66, %99 : f32
    %cst_33 = arith.constant 1.250000e-01 : f32
    %101 = arith.mulf %32, %cst_33 : f32
    %cst_34 = arith.constant 5.000000e-01 : f32
    %102 = arith.mulf %100, %cst_34 : f32
    %103 = arith.subf %101, %102 : f32
    %cst_35 = arith.constant 9.765625E-4 : f32
    %104 = arith.mulf %103, %cst_35 : f32
    %105 = vector.broadcast %104 : f32 to vector<8x128xf32>
    %c0_36 = arith.constant 0 : index
    %c0_37 = arith.constant 0 : index
    %106 = vector.load %arg3[%c0_36, %c0_37] : memref<8x128xf32, #tpu.memory_space<vmem>>, vector<8x128xf32>
    tpu.vector_store %arg3[%c0_36, %c0_37], %105 {strides = array<i32>} : memref<8x128xf32, #tpu.memory_space<vmem>>, vector<8x128xf32>,
    return
  }
  func.func @transform_0(%arg0: i32) -> (i32, i32) {
    %c0_i32 = arith.constant 0 : i32
    %c0_i32_0 = arith.constant 0 : i32
    return %c0_i32, %arg0 : i32, i32
  }
  func.func @transform_1(%arg0: i32) -> (i32, i32) {
    %c0_i32 = arith.constant 0 : i32
    %c0_i32_0 = arith.constant 0 : i32
    return %c0_i32, %arg0 : i32, i32
  }
  func.func @transform_2(%arg0: i32) -> (i32, i32) {
    %c0_i32 = arith.constant 0 : i32
    %c0_i32_0 = arith.constant 0 : i32
    return %arg0, %c0_i32 : i32, i32
  }
}

</mosaic_0001>

<bundles_post_ra>
// kernel: tpu_custom_call.1
= control target key start
LH: loop header
LB: loop body
LE: loop exit
PB: predicated region body
PF: predicated region fallthrough
CT: control target
= control target key end

     0   :  { %s913_s0 = inlined_call_operand.hbm [shape: f32[8,256], index: 0, kind: input, shape index: {}]   ;;  %s914_s1 = inlined_call_operand.hbm [shape: f32[8,256], index: 1, kind: input, shape index: {}]   ;;  %s915_s2 = inlined_call_operand.hbm [shape: f32[16,128], index: 2, kind: output, shape index: {}]  }
   0x1   :  { %918 = sst [smem:[#allocation11_spill]] %s913_s0 }
   0x2   :  { %7 = vsyncpa [#allocation3], 0 }
   0x3   :  { %9 = vsyncpa [#allocation3 + $0x1], 0 }
   0x4   :  { %10 = vsyncpa [#allocation6], 0 }
   0x5   :  { %12 = vsyncpa [#allocation6 + $0x1], 0 }
   0x6   :  { %13 = vsyncpa [#allocation4], 0 }
   0x7   :  { %15 = vsyncpa [#allocation4 + $0x1], 0  ;;  %s693_s9 = smov 0   ;;  %s695_s10 = smov 0  }
   0x8   :  { %s697_s11 = smov 0   ;;  %s699_s12 = smov 0  }
   0x9 LB: > { %s714_s13 = sadd.s32 4294967295, %s673_s12   ;;  %s457_s14 = sadd.s32 4294967294, %s673_s12   ;;  %s673_s12 = sphi %s699_s12, %s936_s12   ;;  %s669_s11 = sphi %s697_s11, %s935_s11   ;;  %s665_s10 = sphi %s695_s10, %s934_s10   ;;  %s661_s9 = sphi %s693_s9, %s933_s9  }
   0xa   : > { %s718_s15 = sadd.s32 1, %s673_s12   ;;  %s28_s16 = sadd.s32 1, %s669_s11 }
   0xb   : > { %s25_s17 = ssub.s32 %s673_s12, %s718_s15  ;;  %p35_p0 = scmp.ne.s32.totalorder %s669_s11, %s665_s10 }
   0xc   : > { %p26_p1 = scmp.eq.s32.totalorder %s25_s17, 0  ;;  %p36_p2 = scmp.eq.s32.totalorder %s673_s12, 0 }
   0xd   : > { %p41_p3 = scmp.ne.s32.totalorder %s665_s10, %s661_s9  ;;  %p42_p4 = scmp.eq.s32.totalorder %s714_s13, 0 }
   0xe   : > { %s730_s18 = scalar_select %p26_p1, %s669_s11, %s28_s16  }
   0xf   : > { %p732_p5 = por %p36_p2, %p35_p0  ;;  %p736_p6 = por %p42_p4, %p41_p3 }
  0x10   : > { %p91_p7 = scmp.eq.s32.totalorder %s714_s13, 1  ;;  %p97_p8 = scmp.eq.s32.totalorder %s457_s14, 1 }
  0x11   : > { %s920_s20 = scalar_select %p736_p6, 1, 0 }
  0x12   : > { %p497_p10 = scmp.lt.s32.totalorder %s673_s12, 2  ;;  %p743_p11 = por %p91_p7, %p35_p0 }
  0x13   : > { %p747_p12 = por %p97_p8, %p41_p3  ;;  %s752_s23 = sand.u32 1, %s669_s11  }
  0x14   : > { %s921_s21 = scalar_select %p743_p11, 1, 0 }
  0x15   : > { %s922_s22 = scalar_select %p747_p12, 1, 0 }
  0x16   : > { %s461_s24 = sshll.u32 %s673_s12, 7  ;;  %s460_s25 = sshll.u32 %s752_s23, 3 }
  0x17   : > { %s923_s0 = sld [smem:[#allocation11_spill]]  ;;  %s121_s29 = scalar_lea.vmem [#allocation2], %s460_s25 }
  0x18   : > { %s128_s30 = sshll.u32 %s121_s29, 4  ;;  %p767_p13 = pnand %p497_p10, %p732_p5  ;;  %s771_s30 = int_to_ptr.vmem [resolvable:$true] %s128_s30 }
  0x19   : > { %s118_s4 = scalar_lea.sflag [#allocation3], %s752_s23 }
  0x1a   : > { %p545_p3 = pneg %p767_p13 }
  0x1d   : > { %s761_s28 = scalar_lea.hbm %s923_s0, %s461_s24  ;;  %s548_s8 = scalar_lea.hbm %s923_s0, 256 }
  0x1e   : > { %s543_s5 = scalar_lea.hbm %s761_s28, 128  ;;  %p549_p5 = scmp.lt.u32.totalorder %s761_s28, %s923_s0 }
  0x1f   : > { %p544_p2 = scmp.ne.s32.totalorder %s761_s28, %s543_s5  ;;  %p550_p8 = scmp.lt.u32.totalorder %s548_s8, %s543_s5 }
  0x20   : > { %p552_p9 = scmp.lt.u32.totalorder %s543_s5, %s761_s28 }
  0x21   : > { %p546_p4 = pnand %p545_p3, %p544_p2  ;;  %p551_p10 = por %p550_p8, %p549_p5 }
  0x23   : > { %p547_p7 = pneg %p546_p4  ;;  %p553_p0 = por %p552_p9, %p551_p10 }
  0x25   : > { %p554_p1 = pnand %p553_p0, %p547_p7 }
  0x27   : > { %557 = shalt.err (!%p554_p1)
}
  0x28   : > { %s558_s17 = scalar_lea.vmem %s771_s30, 128  ;;  %s675_s19 = smov [#allocation2]  }
  0x29   : > { %p559_p2 = scmp.ne.s32.totalorder %s771_s30, %s558_s17  ;;  %s563_s26 = sshll.u32 %s675_s19, 4  ;;  %s564_s26 = int_to_ptr.vmem [resolvable:$false] %s563_s26 }
  0x2a   : > { %s565_s27 = scalar_lea.vmem %s564_s26, 256  ;;  %p566_p11 = scmp.lt.s32.totalorder %s771_s30, %s564_s26 }
  0x2b   : > { %p561_p4 = pnand %p559_p2, %p545_p3  ;;  %p567_p5 = scmp.lt.s32.totalorder %s565_s27, %s558_s17 }
  0x2d   : > { %p562_p12 = pneg %p561_p4  ;;  %p568_p8 = por %p567_p5, %p566_p11 }
  0x2f   : > { %p569_p9 = pnand %p568_p8, %p562_p12 }
  0x31   : > { %572 = shalt.err (!%p569_p9)
}
  0x32   : > { %489 = dma.hbm_to_vmem [thread:$0]  (!%p767_p13), %s761_s28, 128, %s771_s30, %s118_s4  }
  0x33   : > { %p925_p0 = scmp.lt.s32.totalorder %s673_s12, 3  ;;  %p926_p1 = scmp.ge.s32.totalorder %s673_s12, 1 }
  0x34   : > { %s814_s7 = scalar_lea.hbm %s914_s1, %s461_s24  ;;  %s139_s8 = scalar_lea.vmem [#allocation5], %s460_s25 }
  0x35   : > { %p805_p7 = pnand %p926_p1, %p925_p0  ;;  %s146_s14 = sshll.u32 %s139_s8, 4  ;;  %s147_s14 = int_to_ptr.vmem [resolvable:$true] %s146_s14 }
  0x36   : > { %s136_s28 = scalar_lea.sflag [#allocation6], %s752_s23  ;;  %s573_s30 = scalar_lea.hbm %s814_s7, 128 }
  0x37   : > { %s927_s29 = scalar_select %p805_p7, 1, 0 }
  0x38   : > { %p574_p11 = scmp.ne.s32.totalorder %s814_s7, %s573_s30  ;;  %s578_s24 = scalar_lea.hbm %s914_s1, 256 }
  0x39   : > { %p579_p2 = scmp.lt.u32.totalorder %s814_s7, %s914_s1  ;;  %p580_p4 = scmp.lt.u32.totalorder %s578_s24, %s573_s30 }
  0x3a   : > { %p576_p12 = pnand %p574_p11, %p545_p3  ;;  %p582_p8 = scmp.lt.u32.totalorder %s573_s30, %s814_s7 }
  0x3b   : > { %p581_p5 = por %p580_p4, %p579_p2 }
  0x3c   : > { %p577_p10 = pneg %p576_p12 }
  0x3d   : > { %p583_p9 = por %p582_p8, %p581_p5 }
  0x3f   : > { %p584_p0 = pnand %p583_p9, %p577_p10 }
  0x41   : > { %587 = shalt.err (!%p584_p0)
}
  0x42   : > { %s588_s23 = scalar_lea.vmem %s147_s14, 128  ;;  %s676_s25 = smov [#allocation5]  }
  0x43   : > { %p589_p1 = scmp.ne.s32.totalorder %s147_s14, %s588_s23  ;;  %s593_s26 = sshll.u32 %s676_s25, 4  ;;  %s594_s26 = int_to_ptr.vmem [resolvable:$false] %s593_s26 }
  0x44   : > { %s595_s27 = scalar_lea.vmem %s594_s26, 256  ;;  %p596_p6 = scmp.lt.s32.totalorder %s147_s14, %s594_s26 }
  0x45   : > { %p591_p11 = pnand %p589_p1, %p545_p3  ;;  %p597_p7 = scmp.lt.s32.totalorder %s595_s27, %s588_s23 }
  0x47   : > { %p592_p12 = pneg %p591_p11  ;;  %p598_p2 = por %p597_p7, %p596_p6 }
  0x49   : > { %p599_p4 = pnand %p598_p2, %p592_p12 }
  0x4b   : > { %602 = shalt.err (!%p599_p4)
}
  0x4c   : > { %492 = dma.hbm_to_vmem [thread:$0]  (!%p767_p13), %s814_s7, 128, %s147_s14, %s136_s28  }
  0x4d   : > { %p928_p10 = scmp.ne.s32.totalorder %s927_s29, 0 }
  0x4e   : > { %s841_s5 = sand.u32 (!%p928_p10), 1, %s665_s10   ;;  %p929_p6 = scmp.ne.s32.totalorder (!%p928_p10), %s920_s20, 0 }
  0x4f   : > { %155 = sbr.rel (%p928_p10) target bundleno = 493 (0x1ed), region = 28  ;;  %s844_s6 = sshll.u32 (!%p928_p10), %s841_s5, 3 }
  0x50   : > { %s158_s8 = scalar_lea.sflag (!%p928_p10), [#allocation3], %s841_s5  ;;  %s161_s30 = scalar_lea.vmem (!%p928_p10), [#allocation2], %s844_s6 }
  0x56   : > { %648 = dma.done.wait (%p929_p6), %s158_s8, 128  }
  0x57   : > { %650 = vsyncadd (%p929_p6), %s158_s8, 4294967168  ;;  %s167_s3 = scalar_lea.sflag [#allocation6], %s841_s5  ;;  %s170_s29 = scalar_lea.vmem [#allocation5], %s844_s6 }
  0x58   : > { %652 = dma.done.wait (%p929_p6), %s167_s3, 128  }
  0x59   : > { %654 = vsyncadd (%p929_p6), %s167_s3, 4294967168  ;;  %v196_v0 = vld [vmem:[%s161_s30] sm:$0xff]  ;;  %v197_v1 = vld [vmem:[%s170_s29] sm:$0xff]  ;;  %vm241_vm0 = vcmask 1043456   ;;  %vm279_vm1 = vcmask 1040384   ;;  %vm214_vm2 = vcmask 7168  }
  0x5a   : > { %v198_v2 = vsub.f32 1.0, %v196_v0  ;;  %v257_v3 = vand.u32 2147483647, %v196_v0  ;;  %v258_v4 = vand.u32 2147483647, %v197_v1  ;;  %v200_v14 = vsub.f32 1.0, %v197_v1 }
  0x5b   : > { %v207_v5 = vadd.f32 1e-06, %v196_v0  ;;  %v199_v18 = vmul.f32 %v196_v0, %v196_v0  ;;  %v249_v21 = vadd.f32 %v197_v1, %v196_v0  ;;  %v240_v26 = vmul.f32 %v197_v1, %v196_v0  ;;  %s469_s25 = sshll.u32 %s714_s13, 7  ;;  %s195_s27 = scalar_lea.vmem [#allocation7], %s844_s6 }
  0x5c   : > { %v201_v6 = vadd.f32 1e-06, %v198_v2  ;;  %v259_v7 = vadd.f32 %v258_v4, %v257_v3  ;;  %v206_v24 = vmul.f32 %v198_v2, %v198_v2  ;;  %s364_s8 = sshll.u32 %s195_s27, 4  ;;  %s869_s0 = scalar_lea.hbm %s915_s2, %s469_s25  ;;  %s871_s8 = int_to_ptr.vmem [resolvable:$true] %s364_s8 }
  0x5d   : > { %531 = vlog2.f32 %v207_v5  ;;  %v250_v27 = vsel %vm241_vm0, %v249_v21, 0.0  ;;  %v242_v32 = vsel %vm241_vm0, %v240_v26, 0.0  ;;  %v302_v39 = vrot.slane %v249_v21, 4  ;;  %p930_p3 = scmp.ne.s32.totalorder %s921_s21, 0  ;;  %s677_s13 = smov [#allocation7]  }
  0x5e   : > { %533 = vlog2.f32 %v201_v6  ;;  %v260_v8 = vsel %vm241_vm0, %v259_v7, 0.0  ;;  %v312_v9 = vrot.slane %v259_v7, 4  ;;  %v251_v30 = vrot.slane %v250_v27, 4  ;;  %s607_s6 = sshll.u32 %s677_s13, 4  ;;  %s608_s6 = int_to_ptr.vmem [resolvable:$false] %s607_s6 }
  0x5f   : > { %v261_v10 = vrot.slane %v260_v8, 4  ;;  %v243_v35 = vrot.slane %v242_v32, 4  ;;  %v292_v45 = vrot.slane %v240_v26, 4  ;;  %v304_v46 = vsel %vm241_vm0, %v302_v39, 0.0  ;;  %p610_p8 = scmp.lt.s32.totalorder %s871_s8, %s608_s6 }
  0x60   : > { %v314_v11 = vsel %vm241_vm0, %v312_v9, 0.0  ;;  %v252_v36 = vadd.f32 %v251_v30, %v250_v27  ;;  %v305_v49 = vrot.slane %v304_v46, 4 }
  0x61   : > { %v262_v12 = vadd.f32 %v261_v10, %v260_v8  ;;  %v315_v20 = vrot.slane %v314_v11, 4  ;;  %v244_v40 = vadd.f32 %v243_v35, %v242_v32  ;;  %v294_v51 = vsel %vm241_vm0, %v292_v45, 0.0 }
  0x62   : > { %v253_v41 = vrot.slane %v252_v36, 2  ;;  %v295_v54 = vrot.slane %v294_v51, 4  ;;  %v306_v55 = vadd.f32 %v305_v49, %v304_v46 }
  0x63   : > { %v263_v17 = vrot.slane %v262_v12, 2  ;;  %v316_v31 = vadd.f32 %v315_v20, %v314_v11  ;;  %v245_v47 = vrot.slane %v244_v40, 2 }
  0x64   : > { %v254_v48 = vadd.f32 %v253_v41, %v252_v36  ;;  %v296_v59 = vadd.f32 %v295_v54, %v294_v51  ;;  %v307_v60 = vrot.slane %v306_v55, 2 }
  0x65   : > { %v264_v22 = vadd.f32 %v263_v17, %v262_v12  ;;  %v317_v37 = vrot.slane %v316_v31, 2  ;;  %v246_v52 = vadd.f32 %v245_v47, %v244_v40 }
  0x66   : > { %v255_v53 = vrot.slane %v254_v48, 1  ;;  %v308_v2 = vadd.f32 %v307_v60, %v306_v55 }
  0x67   : > { %v532_v13 = vpop.eup %531  ;;  %v265_v28 = vrot.slane %v264_v22, 1  ;;  %v318_v42 = vadd.f32 %v317_v37, %v316_v31  ;;  %v247_v57 = vrot.slane %v246_v52, 1 }
  0x68   : > { %v534_v15 = vpop.eup %533  ;;  %v209_v16 = vmul.f32 0.6931472, %v532_v13  ;;  %v256_v58 = vadd.f32 %v255_v53, %v254_v48  ;;  %v309_v6 = vrot.slane %v308_v2, 1 }
  0x69   : > { %v203_v19 = vmul.f32 0.6931472, %v534_v15  ;;  %v266_v33 = vadd.f32 %v265_v28, %v264_v22  ;;  %v319_v50 = vrot.slane %v318_v42, 1  ;;  %v248_v63 = vadd.f32 %v247_v57, %v246_v52 }
  0x6a   : > { %v210_v25 = vmul.f32 %v209_v16, %v197_v1  ;;  %v267_v0 = vsub.f32 4.0, %v256_v58  ;;  %v297_v1 = vrot.slane %v296_v59, 2  ;;  %v310_v11 = vadd.f32 %v309_v6, %v308_v2 }
  0x6b   : > { %v204_v23 = vmul.f32 %v203_v19, %v200_v14  ;;  %v269_v38 = vsub.f32 8.0, %v266_v33  ;;  %v271_v43 = vadd.f32 1e-06, %v266_v33  ;;  %v320_v56 = vadd.f32 %v319_v50, %v318_v42 }
  0x6c   : > { %v211_v34 = vmul.f32 %v210_v25, %v206_v24  ;;  %v268_v4 = vadd.f32 %v267_v0, %v248_v63  ;;  %v298_v5 = vadd.f32 %v297_v1, %v296_v59  ;;  %v270_v7 = vadd.f32 1e-06, %v248_v63 }
  0x6d   : > { %v205_v29 = vmul.f32 %v204_v23, %v199_v18  ;;  %v275_v44 = vadd.f32 1e-06, %v269_v38  ;;  %535 = vrcp.f32 %v271_v43  ;;  %v323_v61 = vsub.f32 8.0, %v320_v56 }
  0x6e   : > { %v325_v62 = vadd.f32 1e-06, %v320_v56  ;;  %v274_v8 = vadd.f32 1e-06, %v268_v4  ;;  %v299_v9 = vrot.slane %v298_v5, 1  ;;  %v321_v16 = vsub.f32 4.0, %v310_v11 }
  0x6f   : > { %212 = vadd.xlane.f32.xlu0 %v205_v29  ;;  %537 = vrcp.f32 %v275_v44  ;;  %v329_v3 = vadd.f32 1e-06, %v323_v61 }
  0x70   : > { %539 = vrcp.f32 %v325_v62  ;;  %v300_v14 = vadd.f32 %v299_v9, %v298_v5 }
  0x71   : > { %541 = vrcp.f32 %v329_v3 }
  0x72   : > { %v322_v18 = vadd.f32 %v321_v16, %v300_v14  ;;  %v324_v19 = vadd.f32 1e-06, %v300_v14 }
  0x73   : > { %225 = vadd.xlane.f32.xlu0 %v211_v34 }
  0x74   : > { %v328_v22 = vadd.f32 1e-06, %v322_v18 }
  0x77   : > { %v536_v10 = vpop.eup %535 }
  0x78   : > { %v273_v13 = vmul.f32 %v536_v10, %v270_v7 }
  0x79   : > { %v538_v12 = vpop.eup %537 }
  0x7a   : > { %v277_v15 = vmul.f32 %v538_v12, %v274_v8  ;;  %v540_v20 = vpop.eup %539 }
  0x7b   : > { %v327_v23 = vmul.f32 %v540_v20, %v324_v19  ;;  %v542_v24 = vpop.eup %541 }
  0x7c   : > { %v278_v17 = vadd.f32 %v277_v15, %v273_v13  ;;  %v331_v25 = vmul.f32 %v542_v24, %v328_v22 }
  0x7e   : > { %v280_v21 = vsel %vm279_vm1, %v278_v17, 0.0  ;;  %v332_v26 = vadd.f32 %v331_v25, %v327_v23 }
  0x7f   : > { %281 = vadd.xlane.f32.xlu0 %v280_v21 }
  0x80   : > { %v333_v27 = vsel %vm279_vm1, %v332_v26, 0.0 }
  0xfc   : > { %v213_v28 = vpop.xlane.xlu0 %212 }
  0xfd   : > { %v215_v31 = vsel %vm214_vm2, %v213_v28, 0.0 }
 0x100   : > { %v226_v29 = vpop.xlane.xlu0 %225 }
 0x101   : > { %v227_v30 = vsel %vm214_vm2, %v226_v29, 0.0 }
 0x102   : > { %228 = vadd.xlane.f32.xlu1 %v227_v30 }
 0x106   : > { %216 = vadd.xlane.f32.xlu1 %v215_v31 }
 0x10a   : > { %334 = vadd.xlane.f32.xlu1 %v333_v27 }
 0x10c   : > { %v282_v32 = vpop.xlane.xlu0 %281 }
 0x10d   : > { %v283_v33 = vrot.slane %v282_v32, 4 }
 0x10f   : > { %v284_v36 = vadd.f32 %v283_v33, %v282_v32 }
 0x111   : > { %v285_v40 = vrot.slane %v284_v36, 2 }
 0x113   : > { %v286_v45 = vadd.f32 %v285_v40, %v284_v36 }
 0x115   : > { %v287_v53 = vrot.slane %v286_v45, 1 }
 0x117   : > { %v288_v57 = vadd.f32 %v287_v53, %v286_v45 }
 0x18f   : > { %v229_v34 = vpop.xlane.xlu1 %228 }
 0x190   : > { %v230_v35 = vrot.slane %v229_v34, 4 }
 0x192   : > { %v231_v37 = vadd.f32 %v230_v35, %v229_v34 }
 0x193   : > { %v217_v38 = vpop.xlane.xlu1 %216 }
 0x194   : > { %v232_v39 = vrot.slane %v231_v37, 2  ;;  %v218_v41 = vrot.slane %v217_v38, 4 }
 0x196   : > { %v219_v42 = vadd.f32 %v218_v41, %v217_v38  ;;  %v233_v44 = vadd.f32 %v232_v39, %v231_v37 }
 0x197   : > { %v335_v43 = vpop.xlane.xlu1 %334 }
 0x198   : > { %v220_v46 = vrot.slane %v219_v42, 2  ;;  %v336_v47 = vrot.slane %v335_v43, 4  ;;  %v234_v50 = vrot.slane %v233_v44, 1 }
 0x19a   : > { %v337_v48 = vadd.f32 %v336_v47, %v335_v43  ;;  %v221_v49 = vadd.f32 %v220_v46, %v219_v42  ;;  %v235_v56 = vadd.f32 %v234_v50, %v233_v44 }
 0x19c   : > { %v338_v51 = vrot.slane %v337_v48, 2  ;;  %v222_v52 = vrot.slane %v221_v49, 1 }
 0x19e   : > { %v339_v54 = vadd.f32 %v338_v51, %v337_v48  ;;  %v223_v55 = vadd.f32 %v222_v52, %v221_v49 }
 0x1a0   : > { %472 = vpush %v223_v55  ;;  %v340_v58 = vrot.slane %v339_v54, 1 }
 0x1a1   : > { %474 = vpush %v235_v56 }
 0x1a2   : > { %476 = vpush %v288_v57  ;;  %v341_v59 = vadd.f32 %v340_v58, %v339_v54 }
 0x1a4   : > { %478 = vpush %v341_v59 }
 0x1d1   : > { %s473_s20 = spop %472 }
 0x1d2   : > { %s237_s7 = smul.f32 -0.75, %s473_s20  ;;  %s475_s14 = spop %474 }
 0x1d3   : > { %s238_s28 = smul.f32 0.25, %s475_s14  ;;  %s477_s4 = spop %476 }
 0x1d4   : > { %s351_s20 = scalar_lea.sflag [#allocation4], %s841_s5  ;;  %s609_s14 = scalar_lea.vmem %s608_s6, 256 }
 0x1d5   : > { %s239_s16 = ssub.f32 %s237_s7, %s238_s28  ;;  %s479_s24 = spop %478 }
 0x1d6   : > { %s343_s17 = sadd.f32 %s479_s24, %s477_s4  ;;  %s603_s7 = scalar_lea.vmem %s871_s8, 128 }
 0x1d7   : > { %s344_s19 = smul.f32 0.125, %s239_s16  ;;  %p604_p13 = scmp.ne.s32.totalorder %s871_s8, %s603_s7 }
 0x1d8   : > { %s345_s23 = smul.f32 0.5, %s343_s17  ;;  %p611_p9 = scmp.lt.s32.totalorder %s609_s14, %s603_s7 }
 0x1d9   : > { %p605_p7 = pnand %p604_p13, %p930_p3 }
 0x1da   : > { %s346_s26 = ssub.f32 %s344_s19, %s345_s23  ;;  %p612_p0 = por %p611_p9, %p610_p8 }
 0x1db   : > { %p606_p5 = pneg %p605_p7 }
 0x1dc   : > { %s347_s30 = smul.f32 0.0009765625, %s346_s26 }
 0x1dd   : > { %p613_p1 = pnand %p612_p0, %p606_p5 }
 0x1de   : > { %v348_v60 = vstv %s347_s30 }
 0x1df   : > { %349 = vst [vmem:[%s195_s27] sm:$0xff] %v348_v60 }
 0x1e0   : > { %616 = shalt.err (!%p613_p1)
}
 0x1e1   : > { %s617_s5 = scalar_lea.hbm %s869_s0, 128  ;;  %s621_s16 = scalar_lea.hbm %s915_s2, 256 }
 0x1e2   : > { %p618_p11 = scmp.ne.s32.totalorder %s869_s0, %s617_s5  ;;  %p622_p4 = scmp.lt.u32.totalorder %s869_s0, %s915_s2 }
 0x1e3   : > { %p623_p10 = scmp.lt.u32.totalorder %s621_s16, %s617_s5  ;;  %p625_p13 = scmp.lt.u32.totalorder %s617_s5, %s869_s0 }
 0x1e4   : > { %p619_p12 = pnand %p618_p11, %p930_p3 }
 0x1e5   : > { %p624_p6 = por %p623_p10, %p622_p4 }
 0x1e6   : > { %p620_p2 = pneg %p619_p12 }
 0x1e7   : > { %p626_p7 = por %p625_p13, %p624_p6 }
 0x1e9   : > { %p627_p5 = pnand %p626_p7, %p620_p2 }
 0x1eb   : > { %630 = shalt.err (!%p627_p5)
}
 0x1ec   : > { %484 = dma.vmem_to_hbm [thread:$0]  (%p930_p3), %s871_s8, 128, %s869_s0, %s351_s20  }
 0x1ed PF: > { %s376_s19 = sand.u32 1, %s661_s9   ;;  %p931_p8 = scmp.ne.s32.totalorder %s922_s22, 0 }
 0x1ee   : > { %p932_p9 = scmp.ge.s32.totalorder %s673_s12, 2  ;;  %s377_s23 = scalar_lea.sflag [#allocation4], %s376_s19 }
 0x1f0   : > { %p494_p0 = pnand %p932_p9, %p931_p8 }
 0x1f2   : > { %656 = dma.done.wait (!%p494_p0), %s377_s23, 128  }
 0x1f3   : > { %658 = vsyncadd (!%p494_p0), %s377_s23, 4294967168  ;;  %p18_p1 = scmp.ge.s32.totalorder %s718_s15, 4   ;;  %s933_s9 = smov %s665_s10 }
 0x1f4   : > { %s934_s10 = smov %s669_s11  ;;  %s935_s11 = smov %s730_s18 }
 0x1f5   : > { %s936_s12 = smov %s718_s15  ;;  %20 = sbr.rel (!%p18_p1) target bundleno = 9 (0x9), region = 86 }
 0x1fc   :  { %382 = vsyncpa [#allocation3], 1 }
 0x1fd   :  { %384 = vsyncpa [#allocation3 + $0x1], 1 }
 0x1fe   :  { %385 = vsyncpa [#allocation6], 1 }
 0x1ff   :  { %387 = vsyncpa [#allocation6 + $0x1], 1 }
 0x200   :  { %388 = vsyncpa [#allocation4], 1 }
 0x201   :  { %390 = vsyncpa [#allocation4 + $0x1], 1 }

</bundles_post_ra>
